<compile_context>
chip_gen: v6e
topology: v6e:2x2x1
jax: 0.10.0
libtpu: 0.0.40
codegen_flags: <defaults>
</compile_context>

<pallas_src>
import jax
import jax.numpy as jnp
from jax.experimental import pallas as pl
from jax.experimental.pallas import tpu as pltpu


def _round_up(x, m):
    return ((x + m - 1) // m) * m


def critic_kernel(x_ref, w1_ref, b1_ref, w2_ref, b2_ref, w3_ref, b3_ref, o_ref):
    # fc1 + ReLU: (TILE_B, S) @ (S, 128), bf16 inputs, f32 accumulate on MXU.
    h1 = jnp.dot(x_ref[...], w1_ref[...], preferred_element_type=jnp.float32)
    h1 = jnp.maximum(h1 + b1_ref[...], 0.0)
    # fc2 + ReLU: (TILE_B, 128) @ (128, 128)  (fc2 zero-padded 64 -> 128 lanes).
    h2 = jnp.dot(h1.astype(w2_ref.dtype), w2_ref[...],
                 preferred_element_type=jnp.float32)
    h2 = jnp.maximum(h2 + b2_ref[...], 0.0)
    # fc3: 1-output-column matmul replaced by VPU multiply + lane reduce.
    out = jnp.sum(h2 * w3_ref[...], axis=-1, keepdims=True) + b3_ref[...]
    # TODO(synk): for very large B a lane-dense (num_tiles, TILE_B) output slab
    # would avoid the masked (TILE_B, 1) store; irrelevant at small B.
    o_ref[...] = out.astype(o_ref.dtype)


def critic_forward(x, params, tile_b=512):
    """x: (B, state_dim) float32 -> (B, 1) float32."""
    w1, b1, w2, b2, w3, b3 = params
    B, S = x.shape
    H1 = w1.shape[1]          # 128
    H2 = w2.shape[1]          # 64
    H2P = 128                 # fc2 width padded to a full 128-lane vreg

    # --- weight prep (wrapper side, traced once under jit) -------------------
    w2p = jnp.zeros((H1, H2P), jnp.float32).at[:, :H2].set(w2)
    b2p = jnp.zeros((1, H2P), jnp.float32).at[:, :H2].set(b2)
    w3p = jnp.zeros((1, H2P), jnp.float32).at[:, :H2].set(w3.reshape(1, H2))

    xb = x.astype(jnp.bfloat16)
    w1b = w1.astype(jnp.bfloat16)
    w2b = w2p.astype(jnp.bfloat16)

    # --- batch tiling ---------------------------------------------------------
    tile_b = min(tile_b, _round_up(B, 128))
    b_pad = _round_up(B, tile_b)
    if b_pad != B:
        xb = jnp.pad(xb, ((0, b_pad - B), (0, 0)))
    num_tiles = b_pad // tile_b

    flops = 2 * b_pad * (S * H1 + H1 * H2P + H2P)
    bytes_accessed = (
        b_pad * S * 2            # x (bf16)
        + S * H1 * 2             # w1 (bf16)
        + H1 * H2P * 2           # w2 (bf16)
        + (H1 + H2P + H2P + 1) * 4  # b1, b2, w3, b3 (f32)
        + b_pad * 4              # out (f32)
    )

    out = pl.pallas_call(
        critic_kernel,
        out_shape=jax.ShapeDtypeStruct((b_pad, 1), jnp.float32),
        grid_spec=pltpu.PrefetchScalarGridSpec(
            num_scalar_prefetch=0,
            grid=(num_tiles,),
            in_specs=[
                pl.BlockSpec((tile_b, S), lambda i: (i, 0)),   # x tile
                pl.BlockSpec((S, H1), lambda i: (0, 0)),       # w1 (resident)
                pl.BlockSpec((1, H1), lambda i: (0, 0)),       # b1
                pl.BlockSpec((H1, H2P), lambda i: (0, 0)),     # w2 (resident)
                pl.BlockSpec((1, H2P), lambda i: (0, 0)),      # b2
                pl.BlockSpec((1, H2P), lambda i: (0, 0)),      # w3 row
                pl.BlockSpec((1, 1), lambda i: (0, 0)),        # b3
            ],
            out_specs=pl.BlockSpec((tile_b, 1), lambda i: (i, 0)),
        ),
        compiler_params=pltpu.CompilerParams(
            dimension_semantics=("parallel",),
            vmem_limit_bytes=32 * 1024 * 1024,
        ),
        cost_estimate=pl.CostEstimate(
            flops=int(flops), transcendentals=0, bytes_accessed=int(bytes_accessed)
        ),
    )(xb, w1b, b1, w2b, b2p, w3p, b3)
    return out[:B]


def init_critic_params(key, state_dim):
    """Deterministic init mirroring nn.Linear's U(-1/sqrt(fan_in), 1/sqrt(fan_in))."""
    ks = jax.random.split(key, 6)

    def linear(kw, kb, fan_in, fan_out):
        bound = 1.0 / jnp.sqrt(jnp.float32(fan_in))
        w = jax.random.uniform(kw, (fan_in, fan_out), jnp.float32, -bound, bound)
        b = jax.random.uniform(kb, (1, fan_out), jnp.float32, -bound, bound)
        return w, b

    w1, b1 = linear(ks[0], ks[1], state_dim, 128)
    w2, b2 = linear(ks[2], ks[3], 128, 64)
    w3, b3 = linear(ks[4], ks[5], 64, 1)
    return (w1, b1, w2, b2, w3, b3)


if __name__ == "__main__":
    key = jax.random.PRNGKey(0)
    k_param, k_x = jax.random.split(key)

    batch, state_dim = 8, 32
    params = init_critic_params(k_param, state_dim)
    x = jax.random.normal(k_x, (batch, state_dim), jnp.float32)

    out = critic_forward(x, params)
    out = jax.block_until_ready(out)
    assert out.shape == (batch, 1)

    w1, b1, w2, b2, w3, b3 = params

    # Reference with matching bf16 MXU-input casts (f32 accumulation).
    xb = x.astype(jnp.bfloat16)
    h1 = jnp.maximum(
        jnp.dot(xb, w1.astype(jnp.bfloat16), preferred_element_type=jnp.float32) + b1,
        0.0)
    h2 = jnp.maximum(
        jnp.dot(h1.astype(jnp.bfloat16), w2.astype(jnp.bfloat16),
                preferred_element_type=jnp.float32) + b2,
        0.0)
    ref_bf16 = jnp.sum(h2 * w3.reshape(1, -1), axis=-1, keepdims=True) + b3
    assert jnp.allclose(out, ref_bf16, atol=1e-3, rtol=1e-3)

    # Loose sanity check against the pure-f32 PyTorch-equivalent forward.
    ref_f32 = jnp.maximum(x @ w1 + b1, 0.0)
    ref_f32 = jnp.maximum(ref_f32 @ w2 + b2, 0.0)
    ref_f32 = ref_f32 @ w3 + b3
    assert jnp.allclose(out, ref_f32, atol=5e-2, rtol=5e-2)

    print("KERNEL_OK")
</pallas_src>

<mosaic_0001>
module attributes {stable_mosaic.version = 11 : i64} {
  func.func @critic_kernel(%arg0: i32, %arg1: memref<128x32xbf16, #tpu.memory_space<vmem>>, %arg2: memref<32x128xbf16, #tpu.memory_space<vmem>>, %arg3: memref<1x128xf32, #tpu.memory_space<vmem>>, %arg4: memref<128x128xbf16, #tpu.memory_space<vmem>>, %arg5: memref<1x128xf32, #tpu.memory_space<vmem>>, %arg6: memref<1x128xf32, #tpu.memory_space<vmem>>, %arg7: memref<1x1xf32, #tpu.memory_space<vmem>>, %arg8: memref<128x1xf32, #tpu.memory_space<vmem>>) attributes {dimension_semantics = [#tpu.dimension_semantics<parallel>], iteration_bounds = array<i64: 1>, scalar_prefetch = 0 : i64, scratch_operands = 0 : i64, tpu.core_type = #tpu.core_type<tc>, window_params = [{transform_indices = @transform_0, window_bounds = array<i64: 128, 32>}, {pipeline_mode = #tpu.pipeline_mode<synchronous>, transform_indices = @transform_1, window_bounds = array<i64: 32, 128>}, {pipeline_mode = #tpu.pipeline_mode<synchronous>, transform_indices = @transform_2, window_bounds = array<i64: 1, 128>}, {pipeline_mode = #tpu.pipeline_mode<synchronous>, transform_indices = @transform_3, window_bounds = array<i64: 128, 128>}, {pipeline_mode = #tpu.pipeline_mode<synchronous>, transform_indices = @transform_4, window_bounds = array<i64: 1, 128>}, {pipeline_mode = #tpu.pipeline_mode<synchronous>, transform_indices = @transform_5, window_bounds = array<i64: 1, 128>}, {pipeline_mode = #tpu.pipeline_mode<synchronous>, transform_indices = @transform_6, window_bounds = array<i64: 1, 1>}, {transform_indices = @transform_7, window_bounds = array<i64: 128, 1>}]} {
    %c0 = arith.constant 0 : index
    %c0_0 = arith.constant 0 : index
    %0 = vector.load %arg1[%c0, %c0_0] : memref<128x32xbf16, #tpu.memory_space<vmem>>, vector<128x32xbf16>
    %c0_1 = arith.constant 0 : index
    %c0_2 = arith.constant 0 : index
    %1 = vector.load %arg2[%c0_1, %c0_2] : memref<32x128xbf16, #tpu.memory_space<vmem>>, vector<32x128xbf16>
    %cst = arith.constant dense<0.000000e+00> : vector<128x128xf32>
    %2 = tpu.matmul %0, %1, %cst {dimension_numbers = #tpu.dot_dimension_numbers<[1], [0], [0], [1], [0, 0, 1, 1], [], []>} : vector<128x32xbf16>, vector<32x128xbf16>, vector<128x128xf32> -> vector<128x128xf32>
    %c0_3 = arith.constant 0 : index
    %c0_4 = arith.constant 0 : index
    %3 = vector.load %arg3[%c0_3, %c0_4] : memref<1x128xf32, #tpu.memory_space<vmem>>, vector<1x128xf32>
    %4 = vector.broadcast %3 : vector<1x128xf32> to vector<128x128xf32>
    %5 = arith.addf %2, %4 : vector<128x128xf32>
    %cst_5 = arith.constant 0.000000e+00 : f32
    %6 = vector.broadcast %cst_5 : f32 to vector<128x128xf32>
    %7 = arith.maximumf %5, %6 : vector<128x128xf32>
    %8 = arith.truncf %7 : vector<128x128xf32> to vector<128x128xbf16>
    %c0_6 = arith.constant 0 : index
    %c0_7 = arith.constant 0 : index
    %9 = vector.load %arg4[%c0_6, %c0_7] : memref<128x128xbf16, #tpu.memory_space<vmem>>, vector<128x128xbf16>
    %cst_8 = arith.constant dense<0.000000e+00> : vector<128x128xf32>
    %10 = tpu.matmul %8, %9, %cst_8 {dimension_numbers = #tpu.dot_dimension_numbers<[1], [0], [0], [1], [0, 0, 1, 1], [], []>} : vector<128x128xbf16>, vector<128x128xbf16>, vector<128x128xf32> -> vector<128x128xf32>
    %c0_9 = arith.constant 0 : index
    %c0_10 = arith.constant 0 : index
    %11 = vector.load %arg5[%c0_9, %c0_10] : memref<1x128xf32, #tpu.memory_space<vmem>>, vector<1x128xf32>
    %12 = vector.broadcast %11 : vector<1x128xf32> to vector<128x128xf32>
    %13 = arith.addf %10, %12 : vector<128x128xf32>
    %cst_11 = arith.constant 0.000000e+00 : f32
    %14 = vector.broadcast %cst_11 : f32 to vector<128x128xf32>
    %15 = arith.maximumf %13, %14 : vector<128x128xf32>
    %c0_12 = arith.constant 0 : index
    %c0_13 = arith.constant 0 : index
    %16 = vector.load %arg6[%c0_12, %c0_13] : memref<1x128xf32, #tpu.memory_space<vmem>>, vector<1x128xf32>
    %17 = vector.broadcast %16 : vector<1x128xf32> to vector<128x128xf32>
    %18 = arith.mulf %15, %17 : vector<128x128xf32>
    %cst_14 = arith.constant dense<0.000000e+00> : vector<128xf32>
    %19 = vector.multi_reduction <add>, %18, %cst_14 [1] : vector<128x128xf32> to vector<128xf32>
    %20 = vector.shape_cast %19 : vector<128xf32> to vector<128x1xf32>
    %c0_15 = arith.constant 0 : index
    %c0_16 = arith.constant 0 : index
    %21 = vector.load %arg7[%c0_15, %c0_16] : memref<1x1xf32, #tpu.memory_space<vmem>>, vector<1x1xf32>
    %22 = vector.broadcast %21 : vector<1x1xf32> to vector<128x1xf32>
    %23 = arith.addf %20, %22 : vector<128x1xf32>
    %c0_17 = arith.constant 0 : index
    %c0_18 = arith.constant 0 : index
    %24 = vector.load %arg8[%c0_17, %c0_18] : memref<128x1xf32, #tpu.memory_space<vmem>>, vector<128x1xf32>
    tpu.vector_store %arg8[%c0_17, %c0_18], %23 {strides = array<i32>} : memref<128x1xf32, #tpu.memory_space<vmem>>, vector<128x1xf32>,
    return
  }
  func.func @transform_0(%arg0: i32) -> (i32, i32) {
    %c0_i32 = arith.constant 0 : i32
    %c0_i32_0 = arith.constant 0 : i32
    return %arg0, %c0_i32 : i32, i32
  }
  func.func @transform_1(%arg0: i32) -> (i32, i32) {
    %c0_i32 = arith.constant 0 : i32
    %c0_i32_0 = arith.constant 0 : i32
    %c0_i32_1 = arith.constant 0 : i32
    return %c0_i32, %c0_i32_0 : i32, i32
  }
  func.func @transform_2(%arg0: i32) -> (i32, i32) {
    %c0_i32 = arith.constant 0 : i32
    %c0_i32_0 = arith.constant 0 : i32
    %c0_i32_1 = arith.constant 0 : i32
    return %c0_i32, %c0_i32_0 : i32, i32
  }
  func.func @transform_3(%arg0: i32) -> (i32, i32) {
    %c0_i32 = arith.constant 0 : i32
    %c0_i32_0 = arith.constant 0 : i32
    %c0_i32_1 = arith.constant 0 : i32
    return %c0_i32, %c0_i32_0 : i32, i32
  }
  func.func @transform_4(%arg0: i32) -> (i32, i32) {
    %c0_i32 = arith.constant 0 : i32
    %c0_i32_0 = arith.constant 0 : i32
    %c0_i32_1 = arith.constant 0 : i32
    return %c0_i32, %c0_i32_0 : i32, i32
  }
  func.func @transform_5(%arg0: i32) -> (i32, i32) {
    %c0_i32 = arith.constant 0 : i32
    %c0_i32_0 = arith.constant 0 : i32
    %c0_i32_1 = arith.constant 0 : i32
    return %c0_i32, %c0_i32_0 : i32, i32
  }
  func.func @transform_6(%arg0: i32) -> (i32, i32) {
    %c0_i32 = arith.constant 0 : i32
    %c0_i32_0 = arith.constant 0 : i32
    %c0_i32_1 = arith.constant 0 : i32
    return %c0_i32, %c0_i32_0 : i32, i32
  }
  func.func @transform_7(%arg0: i32) -> (i32, i32) {
    %c0_i32 = arith.constant 0 : i32
    %c0_i32_0 = arith.constant 0 : i32
    return %arg0, %c0_i32 : i32, i32
  }
}

</mosaic_0001>

<bundles_post_ra>
// kernel: tpu_custom_call.1
= control target key start
LH: loop header
LB: loop body
LE: loop exit
PB: predicated region body
PF: predicated region fallthrough
CT: control target
= control target key end

     0   :  { %vm108_vm0 = vcmask 261120   ;;  %vm516_vm1 = vcmask 7168   ;;  %s893_s1 = inlined_call_operand.vmem [shape: bf16[32,128], index: 1, kind: input, shape index: {}]   ;;  %s894_s0 = inlined_call_operand.vmem [shape: bf16[128,32], index: 0, kind: input, shape index: {}]   ;;  %s895_s3 = inlined_call_operand.vmem [shape: bf16[128,128], index: 3, kind: input, shape index: {}]   ;;  %s896_s2 = inlined_call_operand.vmem [shape: f32[1,128], index: 2, kind: input, shape index: {}]   ;;  %s897_s6 = inlined_call_operand.<no memory space> [shape: f32[1,1], index: 6, kind: input, shape index: {}]   ;;  %s898_s4 = inlined_call_operand.vmem [shape: f32[1,128], index: 4, kind: input, shape index: {}]   ;;  %s899_s5 = inlined_call_operand.vmem [shape: f32[1,128], index: 5, kind: input, shape index: {}]   ;;  %s900_s7 = inlined_call_operand.vmem [shape: f32[128,1], index: 7, kind: output, shape index: {}]  }
   0x1   :  { %v661_v0 = vld [vmem:[%s893_s1 + $0x8] sm:$0xff]   ;;  %v662_v1 = vld [vmem:[%s893_s1] sm:$0xff]   ;;  %v665_v4 = vld [vmem:[%s894_s0 + $0x10] sm:$0xff]  }
   0x2   :  { %593 = vmatprep.subr.bf16.mxu0 %v661_v0  ;;  %v663_v2 = vld [vmem:[%s894_s0] sm:$0xff]   ;;  %v664_v3 = vld [vmem:[%s894_s0 + $0x8] sm:$0xff]   ;;  %v671_v5 = vld [vmem:[%s895_s3 + $0x38] sm:$0xff]  }
   0x3   :  { %594 = vmatpush3.bf16.msra.mxu0 %v661_v0  ;;  %597 = vmatprep.mubr.msk.bf16.mxu0 %vm108_vm0, %v663_v2  ;;  %v672_v6 = vld [vmem:[%s895_s3 + $0x30] sm:$0xff]   ;;  %v666_v7 = vld [vmem:[%s894_s0 + $0x18] sm:$0xff]   ;;  %v667_v8 = vld [vmem:[%s894_s0 + $0x20] sm:$0xff]  }
   0x4   :  { %595 = vmatprep.subr.bf16.mxu0 %v662_v1  ;;  %645 = vmatprep.subr.bf16.mxu1 %v671_v5  ;;  %v673_v9 = vld [vmem:[%s895_s3 + $0x28] sm:$0xff]   ;;  %v674_v10 = vld [vmem:[%s895_s3 + $0x20] sm:$0xff]   ;;  %v675_v12 = vld [vmem:[%s895_s3 + $0x18] sm:$0xff]  }
   0x5   :  { %653 = vmatpush3.bf16.msra.mxu1 %v671_v5  ;;  %v668_v11 = vld [vmem:[%s894_s0 + $0x28] sm:$0xff]   ;;  %v669_v13 = vld [vmem:[%s894_s0 + $0x30] sm:$0xff]   ;;  %v670_v14 = vld [vmem:[%s894_s0 + $0x38] sm:$0xff]  }
   0x6   :  { %646 = vmatprep.subr.bf16.mxu1 %v672_v6  ;;  %v676_v15 = vld [vmem:[%s895_s3 + $0x10] sm:$0xff]   ;;  %v677_v16 = vld [vmem:[%s895_s3 + $0x8] sm:$0xff]   ;;  %v678_v17 = vld [vmem:[%s895_s3] sm:$0xff]  }
   0x7   :  { %596 = vmatpush3.bf16.msra.mxu0 %v662_v1  ;;  %v537_v20 = vld [vmem:[%s896_s2] ss:$0 sm:$0xff] }
   0x8   :  { %613 = vmatprep.subr.bf16.mxu0 %v671_v5 }
   0x9   :  { %654 = vmatpush3.bf16.msra.mxu1 %v672_v6 }
   0xa   :  { %598 = vmatmul.mubr.msk.bf16.vlgmr.msra.gmra.mxu0 %vm108_vm0, %v664_v3  ;;  %647 = vmatprep.subr.bf16.mxu1 %v673_v9 }
   0xb   :  { %601 = vmatprep.mubr.msk.bf16.mxu0 %vm108_vm0, %v665_v4  ;;  %614 = vmatpush3.bf16.msra.mxu0 %v671_v5 }
   0xc   :  { %615 = vmatprep.subr.bf16.mxu0 %v672_v6 }
   0xd   :  { %655 = vmatpush3.bf16.msra.mxu1 %v673_v9 }
   0xe   :  { %648 = vmatprep.subr.bf16.mxu1 %v674_v10 }
   0xf   :  { %616 = vmatpush3.bf16.msra.mxu0 %v672_v6 }
  0x10   :  { %617 = vmatprep.subr.bf16.mxu0 %v673_v9 }
  0x11   :  { %656 = vmatpush3.bf16.msra.mxu1 %v674_v10 }
  0x12   :  { %602 = vmatmul.mubr.msk.bf16.gmra.mxu0 %vm108_vm0, %v666_v7  ;;  %649 = vmatprep.subr.bf16.mxu1 %v675_v12 }
  0x13   :  { %605 = vmatprep.mubr.msk.bf16.mxu0 %vm108_vm0, %v667_v8  ;;  %618 = vmatpush3.bf16.msra.mxu0 %v673_v9 }
  0x14   :  { %619 = vmatprep.subr.bf16.mxu0 %v674_v10 }
  0x15   :  { %657 = vmatpush3.bf16.msra.mxu1 %v675_v12 }
  0x16   :  { %650 = vmatprep.subr.bf16.mxu1 %v676_v15 }
  0x17   :  { %620 = vmatpush3.bf16.msra.mxu0 %v674_v10 }
  0x18   :  { %621 = vmatprep.subr.bf16.mxu0 %v675_v12 }
  0x19   :  { %658 = vmatpush3.bf16.msra.mxu1 %v676_v15 }
  0x1a   :  { %606 = vmatmul.mubr.msk.bf16.gmra.mxu0 %vm108_vm0, %v668_v11  ;;  %651 = vmatprep.subr.bf16.mxu1 %v677_v16  ;;  %v12_v11 = vstv %s897_s6 }
  0x1b   :  { %609 = vmatprep.mubr.msk.bf16.mxu0 %vm108_vm0, %v669_v13  ;;  %622 = vmatpush3.bf16.msra.mxu0 %v675_v12  ;;  %13 = vst [vmem:[#allocation2] sm:$0x1] %v12_v11  ;;  %v790_v12 = vld [vmem:[%s898_s4] ss:$0 sm:$0xff] }
  0x1c   :  { %623 = vmatprep.subr.bf16.mxu0 %v676_v15 }
  0x1d   :  { %659 = vmatpush3.bf16.msra.mxu1 %v677_v16 }
  0x1e   :  { %652 = vmatprep.subr.bf16.mxu1 %v678_v17 }
  0x1f   :  { %624 = vmatpush3.bf16.msra.mxu0 %v676_v15 }
  0x20   :  { %625 = vmatprep.subr.bf16.mxu0 %v677_v16 }
  0x21   :  { %660 = vmatpush3.bf16.msra.mxu1 %v678_v17 }
  0x22   :  { %610 = vmatmul.mubr.msk.bf16.gmra.mxu0 %vm108_vm0, %v670_v14 }
  0x23   :  { %626 = vmatpush3.bf16.msra.mxu0 %v677_v16  ;;  %v796_v16 = vld [vmem:[%s899_s5] ss:$0 sm:$0xff] }
  0x24   :  { %627 = vmatprep.subr.bf16.mxu0 %v678_v17 }
  0x27   :  { %628 = vmatpush3.bf16.msra.mxu0 %v678_v17 }
  0xca   :  { %v599_v18 = vpop.f32.mrf.mxu0 }
  0xcb   :  { %v176_v24 = vadd.f32 %v599_v18, %v537_v20 }
  0xcc   :  { %v167_v19 = vpop.f32.mrf.mxu0 }
  0xcd   :  { %v168_v22 = vadd.f32 %v537_v20, %v167_v19  ;;  %v232_v31 = vmax.f32 %v176_v24, 0.0 }
  0xce   :  { %v600_v21 = vpop.f32.mrf.mxu0 }
  0xcf   :  { %v179_v23 = vadd.f32 %v600_v21, %v537_v20  ;;  %v230_v29 = vmax.f32 %v168_v22, 0.0 }
  0xd0   :  { %v170_v25 = vpop.f32.mrf.mxu0 }
  0xd1   :  { %v171_v26 = vadd.f32 %v537_v20, %v170_v25  ;;  %v233_v27 = vmax.f32 %v179_v23, 0.0 }
  0xd2   :  { %v603_v28 = vpop.f32.mrf.mxu0 }
  0xd3   :  { %v231_v30 = vmax.f32 %v171_v26, 0.0  ;;  %v247_v34 = vpack.c.bf16 %v233_v27, %v232_v31  ;;  %v192_v38 = vadd.f32 %v603_v28, %v537_v20 }
  0xd4   :  { %v183_v32 = vpop.f32.mrf.mxu0 }
  0xd5   :  { %v246_v33 = vpack.c.bf16 %v231_v30, %v230_v29  ;;  %v184_v36 = vadd.f32 %v537_v20, %v183_v32  ;;  %v236_v45 = vmax.f32 %v192_v38, 0.0 }
  0xd6   :  { %v604_v35 = vpop.f32.mrf.mxu0 }
  0xd7   :  { %v195_v37 = vadd.f32 %v604_v35, %v537_v20  ;;  %629 = vmatprep.mubr.bf16.mxu0 %v246_v33  ;;  %v234_v43 = vmax.f32 %v184_v36, 0.0 }
  0xd8   :  { %v186_v39 = vpop.f32.mrf.mxu0  ;;  %630 = vmatmul.mubr.bf16.vlgmr.msra.gmra.mxu0 %v247_v34 }
  0xd9   :  { %v187_v40 = vadd.f32 %v537_v20, %v186_v39  ;;  %v237_v41 = vmax.f32 %v195_v37, 0.0 }
  0xda   :  { %v607_v42 = vpop.f32.mrf.mxu0 }
  0xdb   :  { %v235_v44 = vmax.f32 %v187_v40, 0.0  ;;  %v249_v48 = vpack.c.bf16 %v237_v41, %v236_v45  ;;  %v208_v52 = vadd.f32 %v607_v42, %v537_v20 }
  0xdc   :  { %v199_v46 = vpop.f32.mrf.mxu0 }
  0xdd   :  { %v248_v47 = vpack.c.bf16 %v235_v44, %v234_v43  ;;  %v200_v50 = vadd.f32 %v537_v20, %v199_v46  ;;  %v240_v59 = vmax.f32 %v208_v52, 0.0 }
  0xde   :  { %v608_v49 = vpop.f32.mrf.mxu0 }
  0xdf   :  { %v211_v51 = vadd.f32 %v608_v49, %v537_v20  ;;  %633 = vmatprep.mubr.bf16.mxu1 %v248_v47  ;;  %v238_v57 = vmax.f32 %v200_v50, 0.0 }
  0xe0   :  { %v202_v53 = vpop.f32.mrf.mxu0  ;;  %634 = vmatmul.mubr.bf16.vlgmr.msra.gmra.mxu1 %v249_v48 }
  0xe1   :  { %v203_v54 = vadd.f32 %v537_v20, %v202_v53  ;;  %v241_v55 = vmax.f32 %v211_v51, 0.0 }
  0xe2   :  { %v611_v56 = vpop.f32.mrf.mxu0 }
  0xe3   :  { %v239_v58 = vmax.f32 %v203_v54, 0.0  ;;  %v251_v62 = vpack.c.bf16 %v241_v55, %v240_v59  ;;  %v224_v2 = vadd.f32 %v611_v56, %v537_v20 }
  0xe4   :  { %v215_v60 = vpop.f32.mrf.mxu0 }
  0xe5   :  { %v250_v61 = vpack.c.bf16 %v239_v58, %v238_v57  ;;  %v216_v0 = vadd.f32 %v537_v20, %v215_v60  ;;  %v244_v8 = vmax.f32 %v224_v2, 0.0 }
  0xe6   :  { %v612_v63 = vpop.f32.mrf.mxu0 }
  0xe7   :  { %v227_v1 = vadd.f32 %v612_v63, %v537_v20  ;;  %637 = vmatprep.mubr.bf16.mxu1 %v250_v61  ;;  %v242_v6 = vmax.f32 %v216_v0, 0.0 }
  0xe8   :  { %v218_v3 = vpop.f32.mrf.mxu0  ;;  %638 = vmatmul.mubr.bf16.gmra.mxu1 %v251_v62 }
  0xe9   :  { %v219_v4 = vadd.f32 %v537_v20, %v218_v3  ;;  %v245_v5 = vmax.f32 %v227_v1, 0.0 }
  0xeb   :  { %v243_v7 = vmax.f32 %v219_v4, 0.0  ;;  %v253_v10 = vpack.c.bf16 %v245_v5, %v244_v8 }
  0xed   :  { %v252_v9 = vpack.c.bf16 %v243_v7, %v242_v6 }
  0xef   :  { %641 = vmatprep.mubr.bf16.mxu1 %v252_v9 }
  0xf0   :  { %642 = vmatmul.mubr.bf16.gmra.mxu1 %v253_v10 }
 0x198   :  { %v631_v13 = vpop.f32.mrf.mxu0 }
 0x199   :  { %v368_v14 = vadd.f32 %v631_v13, %v790_v12 }
 0x19a   :  { %v359_v15 = vpop.f32.mrf.mxu0 }
 0x19b   :  { %v424_v17 = vmax.f32 %v368_v14, 0.0  ;;  %v360_v18 = vadd.f32 %v790_v12, %v359_v15  ;;  %v566_v15 = vld [vmem:[#allocation2] ss:$0 sm:$0xff] }
 0x19c   :  { %v632_v19 = vpop.f32.mrf.mxu0 }
 0x19d   :  { %v422_v20 = vmax.f32 %v360_v18, 0.0  ;;  %v371_v21 = vadd.f32 %v632_v19, %v790_v12  ;;  %v447_v22 = vmul.f32 %v796_v16, %v424_v17 }
 0x19e   :  { %v362_v23 = vpop.f32.mrf.mxu0 }
 0x19f   :  { %v425_v24 = vmax.f32 %v371_v21, 0.0  ;;  %v363_v25 = vadd.f32 %v790_v12, %v362_v23  ;;  %465 = vadd.xlane.f32.xlu1 %v447_v22  ;;  %v445_v26 = vmul.f32 %v796_v16, %v422_v20 }
 0x1a0   :  { %v635_v27 = vpop.f32.mrf.mxu1 }
 0x1a1   :  { %v423_v28 = vmax.f32 %v363_v25, 0.0  ;;  %v384_v29 = vadd.f32 %v635_v27, %v790_v12  ;;  %461 = vadd.xlane.f32.xlu0 %v445_v26  ;;  %v448_v30 = vmul.f32 %v796_v16, %v425_v24 }
 0x1a2   :  { %v375_v31 = vpop.f32.mrf.mxu1 }
 0x1a3   :  { %v428_v32 = vmax.f32 %v384_v29, 0.0  ;;  %v376_v33 = vadd.f32 %v790_v12, %v375_v31  ;;  %467 = vadd.xlane.f32.xlu1 %v448_v30  ;;  %v446_v34 = vmul.f32 %v796_v16, %v423_v28 }
 0x1a4   :  { %v636_v35 = vpop.f32.mrf.mxu1 }
 0x1a5   :  { %v387_v36 = vadd.f32 %v636_v35, %v790_v12  ;;  %463 = vadd.xlane.f32.xlu0 %v446_v34  ;;  %v426_v38 = vmax.f32 %v376_v33, 0.0  ;;  %v451_v41 = vmul.f32 %v796_v16, %v428_v32 }
 0x1a6   :  { %v378_v37 = vpop.f32.mrf.mxu1 }
 0x1a7   :  { %v429_v39 = vmax.f32 %v387_v36, 0.0  ;;  %v379_v40 = vadd.f32 %v790_v12, %v378_v37  ;;  %v449_v49 = vmul.f32 %v796_v16, %v426_v38 }
 0x1a8   :  { %v639_v42 = vpop.f32.mrf.mxu1 }
 0x1a9   :  { %v427_v43 = vmax.f32 %v379_v40, 0.0  ;;  %v400_v44 = vadd.f32 %v639_v42, %v790_v12  ;;  %473 = vadd.xlane.f32.xlu0 %v451_v41  ;;  %v452_v45 = vmul.f32 %v796_v16, %v429_v39 }
 0x1aa   :  { %v391_v46 = vpop.f32.mrf.mxu1 }
 0x1ab   :  { %v432_v47 = vmax.f32 %v400_v44, 0.0  ;;  %v392_v48 = vadd.f32 %v790_v12, %v391_v46  ;;  %475 = vadd.xlane.f32.xlu1 %v452_v45  ;;  %v450_v52 = vmul.f32 %v796_v16, %v427_v43 }
 0x1ac   :  { %v640_v50 = vpop.f32.mrf.mxu1 }
 0x1ad   :  { %v403_v51 = vadd.f32 %v640_v50, %v790_v12  ;;  %469 = vadd.xlane.f32.xlu0 %v449_v49  ;;  %v430_v54 = vmax.f32 %v392_v48, 0.0  ;;  %v455_v57 = vmul.f32 %v796_v16, %v432_v47 }
 0x1ae   :  { %v394_v53 = vpop.f32.mrf.mxu1 }
 0x1af   :  { %v433_v55 = vmax.f32 %v403_v51, 0.0  ;;  %v395_v56 = vadd.f32 %v790_v12, %v394_v53  ;;  %471 = vadd.xlane.f32.xlu1 %v450_v52  ;;  %v453_v0 = vmul.f32 %v796_v16, %v430_v54 }
 0x1b0   :  { %v643_v58 = vpop.f32.mrf.mxu1 }
 0x1b1   :  { %v431_v59 = vmax.f32 %v395_v56, 0.0  ;;  %481 = vadd.xlane.f32.xlu0 %v455_v57  ;;  %v456_v60 = vmul.f32 %v796_v16, %v433_v55  ;;  %v416_v62 = vadd.f32 %v643_v58, %v790_v12 }
 0x1b2   :  { %v407_v61 = vpop.f32.mrf.mxu1 }
 0x1b3   :  { %v408_v63 = vadd.f32 %v790_v12, %v407_v61  ;;  %483 = vadd.xlane.f32.xlu1 %v456_v60  ;;  %v454_v3 = vmul.f32 %v796_v16, %v431_v59  ;;  %v436_v5 = vmax.f32 %v416_v62, 0.0 }
 0x1b4   :  { %v644_v1 = vpop.f32.mrf.mxu1 }
 0x1b5   :  { %v434_v2 = vmax.f32 %v408_v63, 0.0  ;;  %477 = vadd.xlane.f32.xlu0 %v453_v0  ;;  %v419_v6 = vadd.f32 %v644_v1, %v790_v12  ;;  %v459_v13 = vmul.f32 %v796_v16, %v436_v5 }
 0x1b6   :  { %v410_v4 = vpop.f32.mrf.mxu1 }
 0x1b7   :  { %v411_v7 = vadd.f32 %v790_v12, %v410_v4  ;;  %479 = vadd.xlane.f32.xlu1 %v454_v3  ;;  %v457_v8 = vmul.f32 %v796_v16, %v434_v2  ;;  %v437_v10 = vmax.f32 %v419_v6, 0.0 }
 0x1b9   :  { %v435_v9 = vmax.f32 %v411_v7, 0.0  ;;  %485 = vadd.xlane.f32.xlu0 %v457_v8  ;;  %v460_v14 = vmul.f32 %v796_v16, %v437_v10 }
 0x1bb   :  { %v458_v11 = vmul.f32 %v796_v16, %v435_v9 }
 0x1bd   :  { %487 = vadd.xlane.f32.xlu1 %v458_v11  ;;  %489 = vadd.xlane.f32.xlu0 %v459_v13 }
 0x1c1   :  { %491 = vadd.xlane.f32.xlu1 %v460_v14 }
 0x228   :  { %v466_v17 = vpop.xlane.xlu1 %465 }
 0x229   :  { %v502_v18 = vadd.f32 %v566_v15, %v466_v17 }
 0x22a   :  { %v462_v12 = vpop.xlane.xlu0 %461 }
 0x22b   :  { %519 = vst.msk [vmem:[%s900_s7 + $0x10] sm:$0xff] %vm516_vm1, %v502_v18  ;;  %v500_v19 = vadd.f32 %v566_v15, %v462_v12 }
 0x22c   :  { %v468_v20 = vpop.xlane.xlu1 %467 }
 0x22d   :  { %517 = vst.msk [vmem:[%s900_s7] sm:$0xff] %vm516_vm1, %v500_v19  ;;  %v503_v21 = vadd.f32 %v566_v15, %v468_v20 }
 0x22e   :  { %v464_v16 = vpop.xlane.xlu0 %463 }
 0x22f   :  { %520 = vst.msk [vmem:[%s900_s7 + $0x18] sm:$0xff] %vm516_vm1, %v503_v21  ;;  %v501_v22 = vadd.f32 %v566_v15, %v464_v16 }
 0x231   :  { %518 = vst.msk [vmem:[%s900_s7 + $0x8] sm:$0xff] %vm516_vm1, %v501_v22 }
 0x232   :  { %v474_v23 = vpop.xlane.xlu0 %473 }
 0x233   :  { %v506_v24 = vadd.f32 %v566_v15, %v474_v23 }
 0x234   :  { %v476_v25 = vpop.xlane.xlu1 %475 }
 0x235   :  { %523 = vst.msk [vmem:[%s900_s7 + $0x30] sm:$0xff] %vm516_vm1, %v506_v24  ;;  %v507_v26 = vadd.f32 %v566_v15, %v476_v25 }
 0x236   :  { %v470_v27 = vpop.xlane.xlu0 %469 }
 0x237   :  { %524 = vst.msk [vmem:[%s900_s7 + $0x38] sm:$0xff] %vm516_vm1, %v507_v26  ;;  %v504_v28 = vadd.f32 %v566_v15, %v470_v27 }
 0x238   :  { %v472_v29 = vpop.xlane.xlu1 %471 }
 0x239   :  { %521 = vst.msk [vmem:[%s900_s7 + $0x20] sm:$0xff] %vm516_vm1, %v504_v28  ;;  %v505_v30 = vadd.f32 %v566_v15, %v472_v29 }
 0x23a   :  { %v482_v31 = vpop.xlane.xlu0 %481 }
 0x23b   :  { %522 = vst.msk [vmem:[%s900_s7 + $0x28] sm:$0xff] %vm516_vm1, %v505_v30  ;;  %v510_v32 = vadd.f32 %v566_v15, %v482_v31 }
 0x23c   :  { %v484_v33 = vpop.xlane.xlu1 %483 }
 0x23d   :  { %527 = vst.msk [vmem:[%s900_s7 + $0x50] sm:$0xff] %vm516_vm1, %v510_v32  ;;  %v511_v34 = vadd.f32 %v566_v15, %v484_v33 }
 0x23e   :  { %v478_v35 = vpop.xlane.xlu0 %477 }
 0x23f   :  { %528 = vst.msk [vmem:[%s900_s7 + $0x58] sm:$0xff] %vm516_vm1, %v511_v34  ;;  %v508_v36 = vadd.f32 %v566_v15, %v478_v35 }
 0x240   :  { %v480_v37 = vpop.xlane.xlu1 %479 }
 0x241   :  { %525 = vst.msk [vmem:[%s900_s7 + $0x40] sm:$0xff] %vm516_vm1, %v508_v36  ;;  %v509_v38 = vadd.f32 %v566_v15, %v480_v37 }
 0x242   :  { %v486_v39 = vpop.xlane.xlu0 %485 }
 0x243   :  { %526 = vst.msk [vmem:[%s900_s7 + $0x48] sm:$0xff] %vm516_vm1, %v509_v38  ;;  %v512_v40 = vadd.f32 %v566_v15, %v486_v39 }
 0x245   :  { %529 = vst.msk [vmem:[%s900_s7 + $0x60] sm:$0xff] %vm516_vm1, %v512_v40 }
 0x246   :  { %v488_v41 = vpop.xlane.xlu1 %487  ;;  %v490_v42 = vpop.xlane.xlu0 %489 }
 0x247   :  { %v513_v43 = vadd.f32 %v566_v15, %v488_v41  ;;  %v514_v44 = vadd.f32 %v566_v15, %v490_v42 }
 0x249   :  { %530 = vst.msk [vmem:[%s900_s7 + $0x68] sm:$0xff] %vm516_vm1, %v513_v43  ;;  %531 = vst.msk [vmem:[%s900_s7 + $0x70] sm:$0xff] %vm516_vm1, %v514_v44 }
 0x24a   :  { %v492_v45 = vpop.xlane.xlu1 %491 }
 0x24b   :  { %v515_v46 = vadd.f32 %v566_v15, %v492_v45 }
 0x24d   :  { %532 = vst.msk [vmem:[%s900_s7 + $0x78] sm:$0xff] %vm516_vm1, %v515_v46 }

</bundles_post_ra>
